<compile_context>
chip_gen: v7x
topology: tpu7x:2x2x1
jax: 0.10.0
libtpu: 0.0.40
codegen_flags: <defaults>
</compile_context>

<pallas_src>
import jax
import jax.numpy as jnp
import numpy as np
from jax.experimental import pallas as pl
from jax.experimental.pallas import tpu as pltpu

EPS = 1e-5


# ----------------------------------------------------------------------------
# Fused Pallas kernel: all (MAF, BatchNorm) pairs in one invocation
# ----------------------------------------------------------------------------
def make_fused_maf_kernel(n_pairs, n_hidden, D, B):
    """Kernel refs (in order):
       x,
       w_h[0..n_hidden-1]  each [n_pairs, in_l, out_l],
       b_h[0..n_hidden-1]  each [n_pairs, 1, out_l],
       w_head              [n_pairs, H_last, 2*D]   (mu | logp fused),
       b_head              [n_pairs, 1, 2*D],
       bn                  [n_pairs, 3, D]          (gamma, exp(gamma), beta),
       outputs: y [B, D], logdet [B, 1] (written once)."""

    inv_bm1 = 1.0 / float(max(B - 1, 1))  # unbiased variance (torch .var(dim=0))

    def kernel(*refs):
        x_ref = refs[0]
        w_h_refs = refs[1 : 1 + n_hidden]
        b_h_refs = refs[1 + n_hidden : 1 + 2 * n_hidden]
        w_head_ref = refs[1 + 2 * n_hidden]
        b_head_ref = refs[2 + 2 * n_hidden]
        bn_ref = refs[3 + 2 * n_hidden]
        y_ref, ld_ref = refs[-2], refs[-1]

        x = x_ref[...]
        ld_sample = jnp.zeros((B, D), jnp.float32)  # per-sample (0.5*logp) accumulator
        ld_const = jnp.zeros((1, D), jnp.float32)   # batch-independent BN term

        for p in range(n_pairs):  # static unroll; n_pairs is small
            # ---- MAF layer: MADE (masks pre-applied to weights, flip folded in) ----
            h = x
            for l in range(n_hidden):
                w = w_h_refs[l][p]            # [in_l, out_l]
                b = b_h_refs[l][p]            # [1, out_l]
                h = jnp.maximum(
                    jnp.dot(h, w, preferred_element_type=jnp.float32) + b, 0.0
                )

            # fused mu/logp head: one MXU push instead of two
            head = (
                jnp.dot(h, w_head_ref[p], preferred_element_type=jnp.float32)
                + b_head_ref[p]
            )                                  # [B, 2*D]
            mu = head[:, :D]
            logp = head[:, D:]

            u = (x - mu) * jnp.exp(0.5 * logp)
            ld_sample = ld_sample + 0.5 * logp
            # (feature reversal is folded into the parameters -> no in-kernel flip)

            # ---- BatchNorm: training-mode forward, full-batch unbiased stats ----
            bn = bn_ref[p]                     # [3, D]
            gamma = bn[0:1, :]
            exp_gamma = bn[1:2, :]             # exp(gamma) precomputed on host
            beta = bn[2:3, :]

            mean = jnp.mean(u, axis=0, keepdims=True)
            diff = u - mean
            var = jnp.sum(diff * diff, axis=0, keepdims=True) * inv_bm1
            inv_std = jax.lax.rsqrt(var + EPS)
            x = exp_gamma * diff * inv_std + beta
            ld_const = ld_const + (gamma - 0.5 * jnp.log(var + EPS))  # [1, D]

        y_ref[...] = x
        # single reduce + store; scalar BN term folded in once
        # TODO(synk): [B,1] output forces masked vst -- make lane-dense if B grows
        ld_ref[...] = jnp.sum(ld_sample, axis=1, keepdims=True) + jnp.sum(ld_const)

    return kernel


# ----------------------------------------------------------------------------
# Host-side folding of the per-MAF-layer feature reversal into the parameters
# ----------------------------------------------------------------------------
def fold_reverse_into_params(layers, use_reverse):
    """Returns (folded_layers, final_flip). The kernel carries activations in an
    'un-flipped' frame; the reversal after each MAF layer is absorbed by flipping
    rows of the next masked input weight, columns of the mu/logp heads, and the
    gamma/beta of the BN layer that sees flipped features. If the total number of
    flips is odd, one final host-side flip restores the original output order."""
    if not use_reverse:
        return list(layers), False

    folded = []
    c = 0  # parity of accumulated flips on the carried activation
    for layer in layers:
        if layer["type"] == "maf":
            L = dict(layer)
            if c == 1:
                if L["hidden_ws"]:
                    hw = list(L["hidden_ws"])
                    hw[0] = hw[0][::-1, :]          # row-flip first masked weight
                    L["hidden_ws"] = hw
                    L["w_mu"] = L["w_mu"][:, ::-1]   # column-flip output heads
                    L["w_logp"] = L["w_logp"][:, ::-1]
                else:  # no hidden layers: heads take the (flipped) input directly
                    L["w_mu"] = L["w_mu"][::-1, ::-1]
                    L["w_logp"] = L["w_logp"][::-1, ::-1]
                L["b_mu"] = L["b_mu"][:, ::-1]
                L["b_logp"] = L["b_logp"][:, ::-1]
            folded.append(L)
            c ^= 1  # this MAF layer flips its output
        else:
            L = dict(layer)
            if c == 1:
                L["gamma"] = L["gamma"][:, ::-1]
                L["beta"] = L["beta"][:, ::-1]
            folded.append(L)
    return folded, c == 1


# ----------------------------------------------------------------------------
# Host-side parameter packing (few contiguous DMAs instead of many tiny ones)
# ----------------------------------------------------------------------------
def pack_params(folded, n_pairs, n_hidden):
    maf_layers = [folded[2 * p] for p in range(n_pairs)]
    bn_layers = [folded[2 * p + 1] for p in range(n_pairs)]

    w_h = [jnp.stack([m["hidden_ws"][l] for m in maf_layers], axis=0)
           for l in range(n_hidden)]                                  # [P, in_l, out_l]
    b_h = [jnp.stack([m["hidden_bs"][l] for m in maf_layers], axis=0)
           for l in range(n_hidden)]                                  # [P, 1, out_l]
    w_head = jnp.stack(
        [jnp.concatenate([m["w_mu"], m["w_logp"]], axis=1) for m in maf_layers],
        axis=0)                                                       # [P, H, 2D]
    b_head = jnp.stack(
        [jnp.concatenate([m["b_mu"], m["b_logp"]], axis=1) for m in maf_layers],
        axis=0)                                                       # [P, 1, 2D]
    bn = jnp.stack(
        [jnp.concatenate([b["gamma"], jnp.exp(b["gamma"]), b["beta"]], axis=0)
         for b in bn_layers],
        axis=0)                                                       # [P, 3, D]
    return w_h, b_h, w_head, b_head, bn


# ----------------------------------------------------------------------------
# pallas_call wrapper (single fused call for the whole flow)
# ----------------------------------------------------------------------------
def maf_forward(x, layers, use_reverse=True):
    """Equivalent of MAF.forward: returns (x_out, log_det_sum)."""
    B, D = x.shape
    folded, final_flip = fold_reverse_into_params(layers, use_reverse)

    # group into (maf, bn) pairs in order
    assert len(folded) % 2 == 0
    n_pairs = len(folded) // 2
    assert all(folded[2 * p]["type"] == "maf" and folded[2 * p + 1]["type"] == "bn"
               for p in range(n_pairs))
    n_hidden = len(folded[0]["hidden_ws"])

    w_h, b_h, w_head, b_head, bn = pack_params(folded, n_pairs, n_hidden)
    flat = [x] + list(w_h) + list(b_h) + [w_head, b_head, bn]

    vmem = pl.BlockSpec(memory_space=pltpu.MemorySpace.VMEM)
    y, logdet = pl.pallas_call(
        make_fused_maf_kernel(n_pairs, n_hidden, D, B),
        out_shape=(
            jax.ShapeDtypeStruct((B, D), jnp.float32),
            jax.ShapeDtypeStruct((B, 1), jnp.float32),
        ),
        in_specs=[vmem] * len(flat),
        out_specs=(vmem, vmem),
        compiler_params=pltpu.CompilerParams(
            vmem_limit_bytes=32 * 1024 * 1024  # well under 64 MiB physical on v7x
        ),
    )(*flat)

    if final_flip:  # odd number of MAF layers -> one cheap host-side flip
        y = y[:, ::-1]
    return y, logdet[:, 0]


# ----------------------------------------------------------------------------
# Deterministic parameter construction (MADE masks + Linear-style init)
# ----------------------------------------------------------------------------
def _made_degrees(D, hidden_dims):
    degrees = [np.arange(1, D + 1)]                      # input degrees 1..D
    for H in hidden_dims:
        degrees.append((np.arange(H) % (D - 1)) + 1)     # hidden degrees in [1, D-1]
    return degrees


def init_maf_layer(key, D, hidden_dims):
    degs = _made_degrees(D, hidden_dims)
    dims = [D] + list(hidden_dims)

    hidden_ws, hidden_bs = [], []
    for l in range(len(hidden_dims)):
        fan_in, fan_out = dims[l], dims[l + 1]
        key, kw, kb = jax.random.split(key, 3)
        bound = 1.0 / np.sqrt(fan_in)
        w = jax.random.uniform(kw, (fan_in, fan_out), jnp.float32, -bound, bound)
        b = jax.random.uniform(kb, (1, fan_out), jnp.float32, -bound, bound)
        mask = (degs[l + 1][None, :] >= degs[l][:, None]).astype(np.float32)  # [in,out]
        hidden_ws.append(w * jnp.asarray(mask))
        hidden_bs.append(b)

    # output layer: degrees 1..D, strict mask; split into mu / logp heads (== chunk)
    fan_in = dims[-1]
    out_deg = np.arange(1, D + 1)
    out_mask = (out_deg[None, :] > degs[-1][:, None]).astype(np.float32)      # [H, D]
    bound = 1.0 / np.sqrt(fan_in)
    key, k1, k2, k3, k4 = jax.random.split(key, 5)
    w_mu = jax.random.uniform(k1, (fan_in, D), jnp.float32, -bound, bound) * jnp.asarray(out_mask)
    b_mu = jax.random.uniform(k2, (1, D), jnp.float32, -bound, bound)
    w_lp = jax.random.uniform(k3, (fan_in, D), jnp.float32, -bound, bound) * jnp.asarray(out_mask)
    b_lp = jax.random.uniform(k4, (1, D), jnp.float32, -bound, bound)

    return {
        "type": "maf",
        "hidden_ws": hidden_ws,
        "hidden_bs": hidden_bs,
        "w_mu": w_mu,
        "b_mu": b_mu,
        "w_logp": w_lp,
        "b_logp": b_lp,
    }


def init_bn_layer(D):
    # log_gamma and beta initialized to zeros (standard flow batch-norm init)
    return {
        "type": "bn",
        "gamma": jnp.zeros((1, D), jnp.float32),
        "beta": jnp.zeros((1, D), jnp.float32),
    }


def init_maf(key, D, hidden_dims, n_layers):
    layers = []
    for _ in range(n_layers):
        key, sub = jax.random.split(key)
        layers.append(init_maf_layer(sub, D, hidden_dims))
        layers.append(init_bn_layer(D))
    return layers


# ----------------------------------------------------------------------------
# Pure-JAX reference (explicit per-layer flips, unfolded params)
# ----------------------------------------------------------------------------
def maf_forward_ref(x, layers, use_reverse=True):
    B = x.shape[0]
    log_det_sum = jnp.zeros((B,), jnp.float32)
    for layer in layers:
        if layer["type"] == "maf":
            h = x
            for w, b in zip(layer["hidden_ws"], layer["hidden_bs"]):
                h = jnp.maximum(h @ w + b, 0.0)
            mu = h @ layer["w_mu"] + layer["b_mu"]
            logp = h @ layer["w_logp"] + layer["b_logp"]
            u = (x - mu) * jnp.exp(0.5 * logp)
            if use_reverse:
                u = u[:, ::-1]
            x = u
            ld = 0.5 * jnp.sum(logp, axis=1)
        else:
            mean = jnp.mean(x, axis=0, keepdims=True)
            var = jnp.sum((x - mean) ** 2, axis=0, keepdims=True) / (B - 1)
            x_hat = (x - mean) / jnp.sqrt(var + EPS)
            x = jnp.exp(layer["gamma"]) * x_hat + layer["beta"]
            ld = jnp.broadcast_to(
                jnp.sum(layer["gamma"] - 0.5 * jnp.log(var + EPS)), (B,)
            )
        log_det_sum = log_det_sum + ld
    return x, log_det_sum


# ----------------------------------------------------------------------------
if __name__ == "__main__":
    B, D = 8, 8
    hidden_dims = [32, 32]

    key = jax.random.PRNGKey(0)
    kx, kp = jax.random.split(key)
    x = jax.random.normal(kx, (B, D), dtype=jnp.float32)

    # n_layers=2 exercises the flip-folding of the 2nd MAF / 1st BN;
    # n_layers=3 additionally exercises the final host-side flip (odd parity).
    for n_layers in (2, 3):
        kp, sub = jax.random.split(kp)
        layers = init_maf(sub, D, hidden_dims, n_layers)

        y, log_det_sum = maf_forward(x, layers, use_reverse=True)
        jax.block_until_ready((y, log_det_sum))

        y_ref, ld_ref = maf_forward_ref(x, layers, use_reverse=True)
        assert np.allclose(np.asarray(y), np.asarray(y_ref), rtol=1e-4, atol=1e-4)
        assert np.allclose(
            np.asarray(log_det_sum), np.asarray(ld_ref), rtol=1e-4, atol=1e-4
        )

    print("KERNEL_OK")
</pallas_src>

<mosaic_0001>
module attributes {stable_mosaic.version = 11 : i64} {
  func.func @kernel(%arg0: memref<8x8xf32, #tpu.memory_space<vmem>>, %arg1: memref<2x8x32xf32, #tpu.memory_space<vmem>>, %arg2: memref<2x32x32xf32, #tpu.memory_space<vmem>>, %arg3: memref<2x1x32xf32, #tpu.memory_space<vmem>>, %arg4: memref<2x1x32xf32, #tpu.memory_space<vmem>>, %arg5: memref<2x32x16xf32, #tpu.memory_space<vmem>>, %arg6: memref<2x1x16xf32, #tpu.memory_space<vmem>>, %arg7: memref<2x3x8xf32, #tpu.memory_space<vmem>>, %arg8: memref<8x8xf32, #tpu.memory_space<vmem>>, %arg9: memref<8x1xf32, #tpu.memory_space<vmem>>) attributes {dimension_semantics = [], scalar_prefetch = 0 : i64, scratch_operands = 0 : i64, tpu.core_type = #tpu.core_type<tc>} {
    %c0 = arith.constant 0 : index
    %c0_0 = arith.constant 0 : index
    %0 = vector.load %arg0[%c0, %c0_0] : memref<8x8xf32, #tpu.memory_space<vmem>>, vector<8x8xf32>
    %cst = arith.constant 0.000000e+00 : f32
    %1 = vector.broadcast %cst : f32 to vector<8x8xf32>
    %cst_1 = arith.constant 0.000000e+00 : f32
    %2 = vector.broadcast %cst_1 : f32 to vector<1x8xf32>
    %c0_2 = arith.constant 0 : index
    %c0_3 = arith.constant 0 : index
    %c0_4 = arith.constant 0 : index
    %3 = vector.load %arg1[%c0_2, %c0_3, %c0_4] : memref<2x8x32xf32, #tpu.memory_space<vmem>>, vector<1x8x32xf32>
    %4 = vector.shape_cast %3 : vector<1x8x32xf32> to vector<8x32xf32>
    %c0_5 = arith.constant 0 : index
    %c0_6 = arith.constant 0 : index
    %c0_7 = arith.constant 0 : index
    %5 = vector.load %arg3[%c0_5, %c0_6, %c0_7] : memref<2x1x32xf32, #tpu.memory_space<vmem>>, vector<1x1x32xf32>
    %6 = vector.shape_cast %5 : vector<1x1x32xf32> to vector<1x32xf32>
    %cst_8 = arith.constant dense<0.000000e+00> : vector<8x32xf32>
    %7 = tpu.matmul %0, %4, %cst_8 {dimension_numbers = #tpu.dot_dimension_numbers<[1], [0], [0], [1], [0, 0, 1, 1], [], []>} : vector<8x8xf32>, vector<8x32xf32>, vector<8x32xf32> -> vector<8x32xf32>
    %8 = vector.broadcast %6 : vector<1x32xf32> to vector<8x32xf32>
    %9 = arith.addf %7, %8 : vector<8x32xf32>
    %cst_9 = arith.constant 0.000000e+00 : f32
    %10 = vector.broadcast %cst_9 : f32 to vector<8x32xf32>
    %11 = arith.maximumf %9, %10 : vector<8x32xf32>
    %c0_10 = arith.constant 0 : index
    %c0_11 = arith.constant 0 : index
    %c0_12 = arith.constant 0 : index
    %12 = vector.load %arg2[%c0_10, %c0_11, %c0_12] : memref<2x32x32xf32, #tpu.memory_space<vmem>>, vector<1x32x32xf32>
    %13 = vector.shape_cast %12 : vector<1x32x32xf32> to vector<32x32xf32>
    %c0_13 = arith.constant 0 : index
    %c0_14 = arith.constant 0 : index
    %c0_15 = arith.constant 0 : index
    %14 = vector.load %arg4[%c0_13, %c0_14, %c0_15] : memref<2x1x32xf32, #tpu.memory_space<vmem>>, vector<1x1x32xf32>
    %15 = vector.shape_cast %14 : vector<1x1x32xf32> to vector<1x32xf32>
    %cst_16 = arith.constant dense<0.000000e+00> : vector<8x32xf32>
    %16 = tpu.matmul %11, %13, %cst_16 {dimension_numbers = #tpu.dot_dimension_numbers<[1], [0], [0], [1], [0, 0, 1, 1], [], []>} : vector<8x32xf32>, vector<32x32xf32>, vector<8x32xf32> -> vector<8x32xf32>
    %17 = vector.broadcast %15 : vector<1x32xf32> to vector<8x32xf32>
    %18 = arith.addf %16, %17 : vector<8x32xf32>
    %cst_17 = arith.constant 0.000000e+00 : f32
    %19 = vector.broadcast %cst_17 : f32 to vector<8x32xf32>
    %20 = arith.maximumf %18, %19 : vector<8x32xf32>
    %c0_18 = arith.constant 0 : index
    %c0_19 = arith.constant 0 : index
    %c0_20 = arith.constant 0 : index
    %21 = vector.load %arg5[%c0_18, %c0_19, %c0_20] : memref<2x32x16xf32, #tpu.memory_space<vmem>>, vector<1x32x16xf32>
    %22 = vector.shape_cast %21 : vector<1x32x16xf32> to vector<32x16xf32>
    %cst_21 = arith.constant dense<0.000000e+00> : vector<8x16xf32>
    %23 = tpu.matmul %20, %22, %cst_21 {dimension_numbers = #tpu.dot_dimension_numbers<[1], [0], [0], [1], [0, 0, 1, 1], [], []>} : vector<8x32xf32>, vector<32x16xf32>, vector<8x16xf32> -> vector<8x16xf32>
    %c0_22 = arith.constant 0 : index
    %c0_23 = arith.constant 0 : index
    %c0_24 = arith.constant 0 : index
    %24 = vector.load %arg6[%c0_22, %c0_23, %c0_24] : memref<2x1x16xf32, #tpu.memory_space<vmem>>, vector<1x1x16xf32>
    %25 = vector.shape_cast %24 : vector<1x1x16xf32> to vector<1x16xf32>
    %26 = vector.broadcast %25 : vector<1x16xf32> to vector<8x16xf32>
    %27 = arith.addf %23, %26 : vector<8x16xf32>
    %28 = vector.extract_strided_slice %27 {offsets = [0, 0], sizes = [8, 8], strides = [1, 1]} : vector<8x16xf32> to vector<8x8xf32>
    %29 = vector.extract_strided_slice %27 {offsets = [0, 8], sizes = [8, 8], strides = [1, 1]} : vector<8x16xf32> to vector<8x8xf32>
    %30 = arith.subf %0, %28 : vector<8x8xf32>
    %cst_25 = arith.constant 5.000000e-01 : f32
    %31 = vector.broadcast %cst_25 : f32 to vector<8x8xf32>
    %32 = arith.mulf %31, %29 : vector<8x8xf32>
    %33 = math.exp %32 : vector<8x8xf32>
    %34 = arith.mulf %30, %33 : vector<8x8xf32>
    %cst_26 = arith.constant 5.000000e-01 : f32
    %35 = vector.broadcast %cst_26 : f32 to vector<8x8xf32>
    %36 = arith.mulf %35, %29 : vector<8x8xf32>
    %37 = arith.addf %1, %36 : vector<8x8xf32>
    %c0_27 = arith.constant 0 : index
    %c0_28 = arith.constant 0 : index
    %c0_29 = arith.constant 0 : index
    %38 = vector.load %arg7[%c0_27, %c0_28, %c0_29] : memref<2x3x8xf32, #tpu.memory_space<vmem>>, vector<1x3x8xf32>
    %39 = vector.shape_cast %38 : vector<1x3x8xf32> to vector<3x8xf32>
    %40 = vector.extract_strided_slice %39 {offsets = [0, 0], sizes = [1, 8], strides = [1, 1]} : vector<3x8xf32> to vector<1x8xf32>
    %41 = vector.extract_strided_slice %39 {offsets = [1, 0], sizes = [1, 8], strides = [1, 1]} : vector<3x8xf32> to vector<1x8xf32>
    %42 = vector.extract_strided_slice %39 {offsets = [2, 0], sizes = [1, 8], strides = [1, 1]} : vector<3x8xf32> to vector<1x8xf32>
    %cst_30 = arith.constant dense<0.000000e+00> : vector<8xf32>
    %43 = vector.multi_reduction <add>, %34, %cst_30 [0] : vector<8x8xf32> to vector<8xf32>
    %44 = vector.shape_cast %43 : vector<8xf32> to vector<1x8xf32>
    %cst_31 = arith.constant 8.000000e+00 : f32
    %45 = vector.broadcast %cst_31 : f32 to vector<1x8xf32>
    %46 = arith.divf %44, %45 : vector<1x8xf32>
    %47 = vector.broadcast %46 : vector<1x8xf32> to vector<8x8xf32>
    %48 = arith.subf %34, %47 : vector<8x8xf32>
    %49 = arith.mulf %48, %48 : vector<8x8xf32>
    %cst_32 = arith.constant dense<0.000000e+00> : vector<8xf32>
    %50 = vector.multi_reduction <add>, %49, %cst_32 [0] : vector<8x8xf32> to vector<8xf32>
    %51 = vector.shape_cast %50 : vector<8xf32> to vector<1x8xf32>
    %cst_33 = arith.constant 0.142857149 : f32
    %52 = vector.broadcast %cst_33 : f32 to vector<1x8xf32>
    %53 = arith.mulf %51, %52 : vector<1x8xf32>
    %cst_34 = arith.constant 9.99999974E-6 : f32
    %54 = vector.broadcast %cst_34 : f32 to vector<1x8xf32>
    %55 = arith.addf %53, %54 : vector<1x8xf32>
    %56 = math.rsqrt %55 : vector<1x8xf32>
    %57 = vector.broadcast %41 : vector<1x8xf32> to vector<8x8xf32>
    %58 = arith.mulf %57, %48 : vector<8x8xf32>
    %59 = vector.broadcast %56 : vector<1x8xf32> to vector<8x8xf32>
    %60 = arith.mulf %58, %59 : vector<8x8xf32>
    %61 = vector.broadcast %42 : vector<1x8xf32> to vector<8x8xf32>
    %62 = arith.addf %60, %61 : vector<8x8xf32>
    %cst_35 = arith.constant 9.99999974E-6 : f32
    %63 = vector.broadcast %cst_35 : f32 to vector<1x8xf32>
    %64 = arith.addf %53, %63 : vector<1x8xf32>
    %65 = math.log %64 : vector<1x8xf32>
    %cst_36 = arith.constant 5.000000e-01 : f32
    %66 = vector.broadcast %cst_36 : f32 to vector<1x8xf32>
    %67 = arith.mulf %66, %65 : vector<1x8xf32>
    %68 = arith.subf %40, %67 : vector<1x8xf32>
    %69 = arith.addf %2, %68 : vector<1x8xf32>
    %c1 = arith.constant 1 : index
    %c0_37 = arith.constant 0 : index
    %c0_38 = arith.constant 0 : index
    %70 = vector.load %arg1[%c1, %c0_37, %c0_38] : memref<2x8x32xf32, #tpu.memory_space<vmem>>, vector<1x8x32xf32>
    %71 = vector.shape_cast %70 : vector<1x8x32xf32> to vector<8x32xf32>
    %c1_39 = arith.constant 1 : index
    %c0_40 = arith.constant 0 : index
    %c0_41 = arith.constant 0 : index
    %72 = vector.load %arg3[%c1_39, %c0_40, %c0_41] : memref<2x1x32xf32, #tpu.memory_space<vmem>>, vector<1x1x32xf32>
    %73 = vector.shape_cast %72 : vector<1x1x32xf32> to vector<1x32xf32>
    %cst_42 = arith.constant dense<0.000000e+00> : vector<8x32xf32>
    %74 = tpu.matmul %62, %71, %cst_42 {dimension_numbers = #tpu.dot_dimension_numbers<[1], [0], [0], [1], [0, 0, 1, 1], [], []>} : vector<8x8xf32>, vector<8x32xf32>, vector<8x32xf32> -> vector<8x32xf32>
    %75 = vector.broadcast %73 : vector<1x32xf32> to vector<8x32xf32>
    %76 = arith.addf %74, %75 : vector<8x32xf32>
    %cst_43 = arith.constant 0.000000e+00 : f32
    %77 = vector.broadcast %cst_43 : f32 to vector<8x32xf32>
    %78 = arith.maximumf %76, %77 : vector<8x32xf32>
    %c1_44 = arith.constant 1 : index
    %c0_45 = arith.constant 0 : index
    %c0_46 = arith.constant 0 : index
    %79 = vector.load %arg2[%c1_44, %c0_45, %c0_46] : memref<2x32x32xf32, #tpu.memory_space<vmem>>, vector<1x32x32xf32>
    %80 = vector.shape_cast %79 : vector<1x32x32xf32> to vector<32x32xf32>
    %c1_47 = arith.constant 1 : index
    %c0_48 = arith.constant 0 : index
    %c0_49 = arith.constant 0 : index
    %81 = vector.load %arg4[%c1_47, %c0_48, %c0_49] : memref<2x1x32xf32, #tpu.memory_space<vmem>>, vector<1x1x32xf32>
    %82 = vector.shape_cast %81 : vector<1x1x32xf32> to vector<1x32xf32>
    %cst_50 = arith.constant dense<0.000000e+00> : vector<8x32xf32>
    %83 = tpu.matmul %78, %80, %cst_50 {dimension_numbers = #tpu.dot_dimension_numbers<[1], [0], [0], [1], [0, 0, 1, 1], [], []>} : vector<8x32xf32>, vector<32x32xf32>, vector<8x32xf32> -> vector<8x32xf32>
    %84 = vector.broadcast %82 : vector<1x32xf32> to vector<8x32xf32>
    %85 = arith.addf %83, %84 : vector<8x32xf32>
    %cst_51 = arith.constant 0.000000e+00 : f32
    %86 = vector.broadcast %cst_51 : f32 to vector<8x32xf32>
    %87 = arith.maximumf %85, %86 : vector<8x32xf32>
    %c1_52 = arith.constant 1 : index
    %c0_53 = arith.constant 0 : index
    %c0_54 = arith.constant 0 : index
    %88 = vector.load %arg5[%c1_52, %c0_53, %c0_54] : memref<2x32x16xf32, #tpu.memory_space<vmem>>, vector<1x32x16xf32>
    %89 = vector.shape_cast %88 : vector<1x32x16xf32> to vector<32x16xf32>
    %cst_55 = arith.constant dense<0.000000e+00> : vector<8x16xf32>
    %90 = tpu.matmul %87, %89, %cst_55 {dimension_numbers = #tpu.dot_dimension_numbers<[1], [0], [0], [1], [0, 0, 1, 1], [], []>} : vector<8x32xf32>, vector<32x16xf32>, vector<8x16xf32> -> vector<8x16xf32>
    %c1_56 = arith.constant 1 : index
    %c0_57 = arith.constant 0 : index
    %c0_58 = arith.constant 0 : index
    %91 = vector.load %arg6[%c1_56, %c0_57, %c0_58] : memref<2x1x16xf32, #tpu.memory_space<vmem>>, vector<1x1x16xf32>
    %92 = vector.shape_cast %91 : vector<1x1x16xf32> to vector<1x16xf32>
    %93 = vector.broadcast %92 : vector<1x16xf32> to vector<8x16xf32>
    %94 = arith.addf %90, %93 : vector<8x16xf32>
    %95 = vector.extract_strided_slice %94 {offsets = [0, 0], sizes = [8, 8], strides = [1, 1]} : vector<8x16xf32> to vector<8x8xf32>
    %96 = vector.extract_strided_slice %94 {offsets = [0, 8], sizes = [8, 8], strides = [1, 1]} : vector<8x16xf32> to vector<8x8xf32>
    %97 = arith.subf %62, %95 : vector<8x8xf32>
    %cst_59 = arith.constant 5.000000e-01 : f32
    %98 = vector.broadcast %cst_59 : f32 to vector<8x8xf32>
    %99 = arith.mulf %98, %96 : vector<8x8xf32>
    %100 = math.exp %99 : vector<8x8xf32>
    %101 = arith.mulf %97, %100 : vector<8x8xf32>
    %cst_60 = arith.constant 5.000000e-01 : f32
    %102 = vector.broadcast %cst_60 : f32 to vector<8x8xf32>
    %103 = arith.mulf %102, %96 : vector<8x8xf32>
    %104 = arith.addf %37, %103 : vector<8x8xf32>
    %c1_61 = arith.constant 1 : index
    %c0_62 = arith.constant 0 : index
    %c0_63 = arith.constant 0 : index
    %105 = vector.load %arg7[%c1_61, %c0_62, %c0_63] : memref<2x3x8xf32, #tpu.memory_space<vmem>>, vector<1x3x8xf32>
    %106 = vector.shape_cast %105 : vector<1x3x8xf32> to vector<3x8xf32>
    %107 = vector.extract_strided_slice %106 {offsets = [0, 0], sizes = [1, 8], strides = [1, 1]} : vector<3x8xf32> to vector<1x8xf32>
    %108 = vector.extract_strided_slice %106 {offsets = [1, 0], sizes = [1, 8], strides = [1, 1]} : vector<3x8xf32> to vector<1x8xf32>
    %109 = vector.extract_strided_slice %106 {offsets = [2, 0], sizes = [1, 8], strides = [1, 1]} : vector<3x8xf32> to vector<1x8xf32>
    %cst_64 = arith.constant dense<0.000000e+00> : vector<8xf32>
    %110 = vector.multi_reduction <add>, %101, %cst_64 [0] : vector<8x8xf32> to vector<8xf32>
    %111 = vector.shape_cast %110 : vector<8xf32> to vector<1x8xf32>
    %cst_65 = arith.constant 8.000000e+00 : f32
    %112 = vector.broadcast %cst_65 : f32 to vector<1x8xf32>
    %113 = arith.divf %111, %112 : vector<1x8xf32>
    %114 = vector.broadcast %113 : vector<1x8xf32> to vector<8x8xf32>
    %115 = arith.subf %101, %114 : vector<8x8xf32>
    %116 = arith.mulf %115, %115 : vector<8x8xf32>
    %cst_66 = arith.constant dense<0.000000e+00> : vector<8xf32>
    %117 = vector.multi_reduction <add>, %116, %cst_66 [0] : vector<8x8xf32> to vector<8xf32>
    %118 = vector.shape_cast %117 : vector<8xf32> to vector<1x8xf32>
    %cst_67 = arith.constant 0.142857149 : f32
    %119 = vector.broadcast %cst_67 : f32 to vector<1x8xf32>
    %120 = arith.mulf %118, %119 : vector<1x8xf32>
    %cst_68 = arith.constant 9.99999974E-6 : f32
    %121 = vector.broadcast %cst_68 : f32 to vector<1x8xf32>
    %122 = arith.addf %120, %121 : vector<1x8xf32>
    %123 = math.rsqrt %122 : vector<1x8xf32>
    %124 = vector.broadcast %108 : vector<1x8xf32> to vector<8x8xf32>
    %125 = arith.mulf %124, %115 : vector<8x8xf32>
    %126 = vector.broadcast %123 : vector<1x8xf32> to vector<8x8xf32>
    %127 = arith.mulf %125, %126 : vector<8x8xf32>
    %128 = vector.broadcast %109 : vector<1x8xf32> to vector<8x8xf32>
    %129 = arith.addf %127, %128 : vector<8x8xf32>
    %cst_69 = arith.constant 9.99999974E-6 : f32
    %130 = vector.broadcast %cst_69 : f32 to vector<1x8xf32>
    %131 = arith.addf %120, %130 : vector<1x8xf32>
    %132 = math.log %131 : vector<1x8xf32>
    %cst_70 = arith.constant 5.000000e-01 : f32
    %133 = vector.broadcast %cst_70 : f32 to vector<1x8xf32>
    %134 = arith.mulf %133, %132 : vector<1x8xf32>
    %135 = arith.subf %107, %134 : vector<1x8xf32>
    %136 = arith.addf %69, %135 : vector<1x8xf32>
    %c0_71 = arith.constant 0 : index
    %c0_72 = arith.constant 0 : index
    %137 = vector.load %arg8[%c0_71, %c0_72] : memref<8x8xf32, #tpu.memory_space<vmem>>, vector<8x8xf32>
    tpu.vector_store %arg8[%c0_71, %c0_72], %129 {strides = array<i32>} : memref<8x8xf32, #tpu.memory_space<vmem>>, vector<8x8xf32>,
    %cst_73 = arith.constant dense<0.000000e+00> : vector<8xf32>
    %138 = vector.multi_reduction <add>, %104, %cst_73 [1] : vector<8x8xf32> to vector<8xf32>
    %139 = vector.shape_cast %138 : vector<8xf32> to vector<8x1xf32>
    %140 = vector.shape_cast %136 : vector<1x8xf32> to vector<1x1x8xf32>
    %cst_74 = arith.constant dense<0.000000e+00> : vector<1xf32>
    %141 = vector.multi_reduction <add>, %140, %cst_74 [1, 2] : vector<1x1x8xf32> to vector<1xf32>
    %142 = vector.shape_cast %141 : vector<1xf32> to vector<1x1x1xf32>
    %143 = vector.extract %142[0, 0, 0] : f32 from vector<1x1x1xf32>
    %144 = vector.broadcast %143 : f32 to vector<8x1xf32>
    %145 = arith.addf %139, %144 : vector<8x1xf32>
    %c0_75 = arith.constant 0 : index
    %c0_76 = arith.constant 0 : index
    %146 = vector.load %arg9[%c0_75, %c0_76] : memref<8x1xf32, #tpu.memory_space<vmem>>, vector<8x1xf32>
    tpu.vector_store %arg9[%c0_75, %c0_76], %145 {strides = array<i32>} : memref<8x1xf32, #tpu.memory_space<vmem>>, vector<8x1xf32>,
    return
  }
}

</mosaic_0001>

<bundles_post_ra>
// kernel: tpu_custom_call.1
= control target key start
LH: loop header
LB: loop body
LE: loop exit
PB: predicated region body
PF: predicated region fallthrough
CT: control target
= control target key end

     0   :  { %vm41_vm0 = vcmask 64512   ;;  %v850_v2 = vmov 0.0   ;;  %vm851_vm1 = vmmov 0   ;;  %v852_v5 = vmov 0.0|0.0   ;;  %s1067_s0 = inlined_call_operand.vmem [shape: f32[8,8], index: 0, kind: input, shape index: {}]   ;;  %s1068_s1 = inlined_call_operand.vmem [shape: f32[2,8,32], index: 1, kind: input, shape index: {}]   ;;  %s1069_s2 = inlined_call_operand.vmem [shape: f32[2,32,32], index: 2, kind: input, shape index: {}]   ;;  %s1070_s3 = inlined_call_operand.vmem [shape: f32[2,1,32], index: 3, kind: input, shape index: {}]   ;;  %s1071_s4 = inlined_call_operand.vmem [shape: f32[2,1,32], index: 4, kind: input, shape index: {}]   ;;  %s1072_s5 = inlined_call_operand.vmem [shape: f32[2,32,16], index: 5, kind: input, shape index: {}]   ;;  %s1073_s6 = inlined_call_operand.vmem [shape: f32[2,1,16], index: 6, kind: input, shape index: {}]   ;;  %s1074_s7 = inlined_call_operand.vmem [shape: f32[2,3,8], index: 7, kind: input, shape index: {}]   ;;  %s1075_s8 = inlined_call_operand.hbm [shape: f32[8,8], index: 8, kind: output, shape index: {0}]   ;;  %s1076_s9 = inlined_call_operand.vmem [shape: f32[8,1], index: 9, kind: output, shape index: {1}]  }
   0x1   :  { %v33_v0 = vld [vmem:[%s1068_s1] sm:$0xff]  ;;  %729 = vmatprep.subr.mxu0 %v850_v2  ;;  %731 = vmatprep.mubr.msk.f32.mxu0 %vm851_vm1, %v850_v2  ;;  %v117_v4 = vld [vmem:[%s1069_s2 + $0x8] sm:$0xff] }
   0x2   :  { %v911_v1 = vld [vmem:[%s1067_s0] sm:$0xff]  ;;  %730 = vmatpush3.msra.mxu0 %v33_v0  ;;  %783 = vmatprep.subr.bf16.mxu1 %v852_v5 }
   0x3   :  { %v116_v3 = vld [vmem:[%s1069_s2] sm:$0xff] }
   0x4   :  { %v784_v6 = vpack.c.bf16 %v117_v4, %v116_v3 }
   0x5   :  { %15 = vsyncpa [#allocation3], 0  ;;  %732 = vmatmul.mubr.msk.f32.vlgmr.msra.gmra.mrb[0].mxu0 %vm41_vm0, %v911_v1  ;;  %742 = vmatprep.mubr.msk.f32.mxu1 %vm851_vm1, %v850_v2  ;;  %v118_v7 = vld [vmem:[%s1069_s2 + $0x10] sm:$0xff]  ;;  %v119_v8 = vld [vmem:[%s1069_s2 + $0x18] sm:$0xff]  ;;  %vm127_vm2 = vcmask 261120   ;;  %s853_s13 = smov 120   ;;  %v318_v56 = vlaneseq }
   0x6   :  { %785 = vmatpush3.bf16.msra.mxu1 %v784_v6  ;;  %789 = vmatprep.subr.bf16.mxu0 %v852_v5  ;;  %v787_v9 = vpack.c.bf16 %v119_v8, %v118_v7  ;;  %v202_v10 = vld [vmem:[%s1072_s5] sm:$0xff]  ;;  %v203_v11 = vld [vmem:[%s1072_s5 + $0x8] sm:$0xff]  ;;  %v204_v18 = vld [vmem:[%s1072_s5 + $0x10] sm:$0xff]  ;;  %vm647_vm3 = vcmask 57344  }
   0x7   :  { %786 = vmatprep.subr.bf16.mxu1 %v852_v5  ;;  %753 = vmatprep.mubr.msk.f32.mxu0 %vm851_vm1, %v850_v2  ;;  %v790_v12 = vpack.c.bf16 %v203_v11, %v202_v10  ;;  %v680_v13 = vld [vmem:[%s1070_s3] ss:$0 sm:$0xff]  ;;  %v205_v19 = vld [vmem:[%s1072_s5 + $0x18] sm:$0xff]  ;;  %v686_v33 = vld [vmem:[%s1068_s1 + $0x8] sm:$0xff]  ;;  %v985_v59 = vshrl.u32 %v318_v56, 7 }
   0x8   :  { %v793_v20 = vpack.c.bf16 %v205_v19, %v204_v18  ;;  %v682_v21 = vld [vmem:[%s1071_s4] ss:$0 sm:$0xff]  ;;  %v691_v35 = vld [vmem:[%s1069_s2 + $0x28] sm:$0xff]  ;;  %v692_v8 = vld [vmem:[%s1069_s2 + $0x30] sm:$0xff] }
   0x9   :  { %791 = vmatpush3.bf16.msra.mxu0 %v790_v12  ;;  %v684_v26 = vld [vmem:[%s1073_s6] ss:$0 sm:$0xff]  ;;  %v320_v61 = vsub.s32 1, %v985_v59  ;;  %v326_v0 = vsub.s32 2, %v985_v59  ;;  %v698_v12 = vld [vmem:[%s1072_s5 + $0x28] sm:$0xff]  ;;  %v699_v18 = vld [vmem:[%s1072_s5 + $0x30] sm:$0xff] }
   0xa   :  { %788 = vmatpush3.bf16.msra.mxu1 %v787_v9  ;;  %792 = vmatprep.subr.bf16.mxu0 %v852_v5  ;;  %v690_v34 = vld [vmem:[%s1069_s2 + $0x20] sm:$0xff]  ;;  %v693_v9 = vld [vmem:[%s1069_s2 + $0x38] sm:$0xff] }
   0xb   :  { %756 = vmatprep.subr.mxu1 %v850_v2  ;;  %v796_v36 = vpack.c.bf16 %v691_v35, %v690_v34  ;;  %v994_v62 = vld [vmem:[%s1074_s7] sm:$0x7]  ;;  %v799_v10 = vpack.c.bf16 %v693_v9, %v692_v8  ;;  %v700_v19 = vld [vmem:[%s1072_s5 + $0x38] sm:$0xff] }
   0xc   :  { %v321_v63 = vrot.slane %v994_v62, %v320_v61  ;;  %v697_v11 = vld [vmem:[%s1072_s5 + $0x20] sm:$0xff] }
   0xd   :  { %794 = vmatpush3.bf16.msra.mxu0 %v793_v20  ;;  %v805_v20 = vpack.c.bf16 %v700_v19, %v699_v18 }
   0xe   :  { %795 = vmatprep.subr.bf16.mxu0 %v852_v5 }
  0xd8   :  { %v111_v14 = vpop.f32.mrb[0].mxu0 }
  0xd9   :  { %v112_v15 = vadd.f32 %v680_v13, %v111_v14  ;;  %v733_v16 = vpop.f32.mrb[1].mxu0  ;;  %v802_v13 = vpack.c.bf16 %v698_v12, %v697_v11 }
  0xdb   :  { %v115_v17 = vmax.f32 %v112_v15, 0.0 }
  0xdd   :  { %743 = vmatmul.mubr.msk.f32.vlgmr.msra.gmra.mrb[0].mxu1 %vm127_vm2, %v115_v17 }
  0xde   :  { %758 = vmatprep.mubr.msk.f32.mxu1 %vm851_vm1, %v850_v2  ;;  %757 = vmatpush3.msra.mxu1 %v686_v33 }
  0xdf   :  { %801 = vmatprep.subr.bf16.mxu1 %v852_v5 }
 0x1b0   :  { %v197_v22 = vpop.f32.mrb[0].mxu1 }
 0x1b1   :  { %v198_v23 = vadd.f32 %v682_v21, %v197_v22  ;;  %v744_v24 = vpop.f32.mrb[1].mxu1 }
 0x1b3   :  { %v201_v25 = vmax.f32 %v198_v23, 0.0 }
 0x1b5   :  { %754 = vmatmul.mubr.msk.f32.vlgmr.msra.gmra.mrb[2].mxu0 %vm127_vm2, %v201_v25  ;;  %v702_v25 = vld [vmem:[%s1073_s6 + $0x1] ss:$0 sm:$0xff]  ;;  %s854_s6 = smov [#allocation2]  }
 0x1b6   :  { %769 = vmatprep.mubr.msk.f32.mxu0 %vm851_vm1, %v850_v2  ;;  %797 = vmatpush3.bf16.msra.mxu0 %v796_v36 }
 0x1b7   :  { %798 = vmatprep.subr.bf16.mxu0 %v852_v5 }
 0x1ba   :  { %800 = vmatpush3.bf16.msra.mxu0 %v799_v10 }
 0x288   :  { %v282_v27 = vpop.f32.mrb[2].mxu0 }
 0x289   :  { %v283_v28 = vadd.f32 %v684_v26, %v282_v27  ;;  %v755_v29 = vpop.f32.mrb[3].mxu0 }
 0x28b   :  { %v967_v30 = vmul.f32 0.5, %v283_v28  ;;  %v286_v37 = vsub.f32 %v911_v1, %v283_v28  ;;  %v327_v1 = vrot.slane %v994_v62, %v326_v0 }
 0x28d   :  { %v288_v31 = vmul.f32 1.442695, %v967_v30 }
 0x28f   :  { %814 = vpow2.f32 %v288_v31 }
 0x299   :  { %v815_v32 = vpop.eup %814 }
 0x29a   :  { %291 = vrot.lane.b32.xlu0 %v815_v32, %s853_s13 }
 0x30c   :  { %v292_v38 = vpop.permute.xlu0 %291 }
 0x30d   :  { %v294_v39 = vmul.f32 %v292_v38, %v286_v37 }
 0x30f   :  { %v297_v40 = vsel %vm41_vm0, %v294_v39, 0.0 }
 0x310   :  { %v298_v41 = vrot.slane %v297_v40, 4 }
 0x312   :  { %v299_v42 = vadd.f32 %v298_v41, %v297_v40 }
 0x314   :  { %v300_v43 = vrot.slane %v299_v42, 2 }
 0x316   :  { %v301_v44 = vadd.f32 %v300_v43, %v299_v42 }
 0x318   :  { %v302_v45 = vrot.slane %v301_v44, 1 }
 0x31a   :  { %v303_v46 = vadd.f32 %v302_v45, %v301_v44 }
 0x31c   :  { %v305_v47 = vmul.f32 0.125, %v303_v46 }
 0x31e   :  { %v306_v48 = vsub.f32 %v294_v39, %v305_v47 }
 0x320   :  { %v307_v49 = vmul.f32 %v306_v48, %v306_v48  ;;  %v322_v3 = vmul.f32 %v321_v63, %v306_v48 }
 0x322   :  { %v308_v50 = vsel %vm41_vm0, %v307_v49, 0.0 }
 0x323   :  { %v309_v51 = vrot.slane %v308_v50, 4 }
 0x325   :  { %v310_v52 = vadd.f32 %v309_v51, %v308_v50 }
 0x327   :  { %v311_v53 = vrot.slane %v310_v52, 2 }
 0x329   :  { %v312_v54 = vadd.f32 %v311_v53, %v310_v52 }
 0x32b   :  { %v313_v55 = vrot.slane %v312_v54, 1 }
 0x32d   :  { %v314_v57 = vadd.f32 %v313_v55, %v312_v54  ;;  %v704_v55 = vld [vmem:[%s1074_s7 + $0x4] sm:$0x7]  ;;  %s668_s7 = sshll.u32 %s854_s6, 4  ;;  %s669_s7 = int_to_ptr.vmem [resolvable:$true] %s668_s7 }
 0x32e   :  { %s826_s16 = scalar_lea.vmem %s669_s7, 128  ;;  %p831_p1 = scmp.lt.s32.totalorder %s669_s7, %s669_s7 }
 0x32f   :  { %v315_v58 = vmul.f32 0.14285715, %v314_v57  ;;  %v626_v57 = vrot.slane %v704_v55, %v320_v61  ;;  %p827_p0 = scmp.ne.s32.totalorder %s669_s7, %s826_s16  ;;  %p832_p2 = scmp.lt.s32.totalorder %s826_s16, %s826_s16 }
 0x331   :  { %v987_v60 = vadd.f32 1e-05, %v315_v58  ;;  %p833_p3 = por %p832_p2, %p831_p1 }
 0x333   :  { %816 = vrsqrt.f32 %v987_v60  ;;  %p834_p4 = pnand %p833_p3, %p827_p0 }
 0x33d   :  { %v817_v4 = vpop.eup %816 }
 0x33e   :  { %v323_v6 = vmul.f32 %v817_v4, %v322_v3  ;;  %v632_v3 = vrot.slane %v704_v55, %v326_v0 }
 0x340   :  { %v328_v7 = vadd.f32 %v327_v1, %v323_v6 }
 0x342   :  { %759 = vmatmul.mubr.msk.f32.vlgmr.msra.gmra.mrb[2].mxu1 %vm41_vm0, %v328_v7 }
 0x343   :  { %780 = vmatprep.mubr.msk.f32.mxu1 %vm851_vm1, %v850_v2  ;;  %803 = vmatpush3.bf16.msra.mxu1 %v802_v13  ;;  %v688_v2 = vld [vmem:[%s1070_s3 + $0x1] ss:$0 sm:$0xff] }
 0x344   :  { %804 = vmatprep.subr.bf16.mxu1 %v852_v5  ;;  %v695_v5 = vld [vmem:[%s1071_s4 + $0x1] ss:$0 sm:$0xff] }
 0x347   :  { %806 = vmatpush3.bf16.msra.mxu1 %v805_v20 }
 0x415   :  { %v413_v14 = vpop.f32.mrb[2].mxu1 }
 0x416   :  { %v414_v15 = vadd.f32 %v688_v2, %v413_v14  ;;  %v760_v16 = vpop.f32.mrb[3].mxu1 }
 0x418   :  { %v417_v17 = vmax.f32 %v414_v15, 0.0 }
 0x41a   :  { %770 = vmatmul.mubr.msk.f32.vlgmr.msra.gmra.mrb[4].mxu0 %vm127_vm2, %v417_v17 }
 0x4ed   :  { %v500_v21 = vpop.f32.mrb[4].mxu0 }
 0x4ee   :  { %v501_v22 = vadd.f32 %v695_v5, %v500_v21  ;;  %v771_v23 = vpop.f32.mrb[5].mxu0 }
 0x4f0   :  { %v504_v24 = vmax.f32 %v501_v22, 0.0 }
 0x4f2   :  { %781 = vmatmul.mubr.msk.f32.vlgmr.msra.gmra.mrb[4].mxu1 %vm127_vm2, %v504_v24 }
 0x5c5   :  { %v587_v26 = vpop.f32.mrb[4].mxu1 }
 0x5c6   :  { %v588_v27 = vadd.f32 %v702_v25, %v587_v26  ;;  %v782_v28 = vpop.f32.mrb[5].mxu1 }
 0x5c8   :  { %v592_v29 = vmul.f32 0.5, %v588_v27  ;;  %v591_v33 = vsub.f32 %v328_v7, %v588_v27 }
 0x5ca   :  { %v593_v31 = vmul.f32 1.442695, %v592_v29  ;;  %v600_v13 = vadd.f32 %v592_v29, %v967_v30 }
 0x5cc   :  { %818 = vpow2.f32 %v593_v31 }
 0x5cd   :  { %820 = vlog2.f32 %v987_v60 }
 0x5d6   :  { %v819_v32 = vpop.eup %818 }
 0x5d7   :  { %596 = vrot.lane.b32.xlu0 %v819_v32, %s853_s13  ;;  %v821_v56 = vpop.eup %820 }
 0x5d8   :  { %v330_v58 = vmul.f32 0.6931472, %v821_v56 }
 0x5da   :  { %v331_v60 = vmul.f32 0.5, %v330_v58 }
 0x5dc   :  { %v332_v10 = vsub.f32 %v994_v62, %v331_v60 }
 0x649   :  { %v597_v34 = vpop.permute.xlu0 %596 }
 0x64a   :  { %v599_v35 = vmul.f32 %v597_v34, %v591_v33 }
 0x64c   :  { %v603_v36 = vsel %vm41_vm0, %v599_v35, 0.0 }
 0x64d   :  { %v604_v37 = vrot.slane %v603_v36, 4 }
 0x64f   :  { %v605_v38 = vadd.f32 %v604_v37, %v603_v36 }
 0x651   :  { %v606_v39 = vrot.slane %v605_v38, 2 }
 0x653   :  { %v607_v40 = vadd.f32 %v606_v39, %v605_v38 }
 0x655   :  { %v608_v41 = vrot.slane %v607_v40, 1 }
 0x657   :  { %v609_v42 = vadd.f32 %v608_v41, %v607_v40 }
 0x659   :  { %v610_v43 = vmul.f32 0.125, %v609_v42 }
 0x65b   :  { %v611_v44 = vsub.f32 %v599_v35, %v610_v43 }
 0x65d   :  { %v612_v45 = vmul.f32 %v611_v44, %v611_v44  ;;  %v627_v1 = vmul.f32 %v626_v57, %v611_v44 }
 0x65f   :  { %v613_v46 = vsel %vm41_vm0, %v612_v45, 0.0 }
 0x660   :  { %v614_v47 = vrot.slane %v613_v46, 4 }
 0x662   :  { %v615_v48 = vadd.f32 %v614_v47, %v613_v46 }
 0x664   :  { %v616_v49 = vrot.slane %v615_v48, 2 }
 0x666   :  { %v617_v50 = vadd.f32 %v616_v49, %v615_v48 }
 0x668   :  { %v618_v51 = vrot.slane %v617_v50, 1 }
 0x66a   :  { %v619_v52 = vadd.f32 %v618_v51, %v617_v50 }
 0x66c   :  { %v620_v53 = vmul.f32 0.14285715, %v619_v52 }
 0x66e   :  { %v621_v54 = vadd.f32 1e-05, %v620_v53 }
 0x670   :  { %822 = vlog2.f32 %v621_v54 }
 0x671   :  { %824 = vrsqrt.f32 %v621_v54 }
 0x67a   :  { %v823_v63 = vpop.eup %822 }
 0x67b   :  { %v825_v4 = vpop.eup %824  ;;  %v635_v6 = vmul.f32 0.6931472, %v823_v63 }
 0x67c   :  { %v628_v7 = vmul.f32 %v825_v4, %v627_v1 }
 0x67d   :  { %v636_v8 = vmul.f32 0.5, %v635_v6 }
 0x67e   :  { %v633_v9 = vadd.f32 %v632_v3, %v628_v7 }
 0x67f   :  { %v637_v11 = vsub.f32 %v704_v55, %v636_v8 }
 0x680   :  { %639 = vst.msk [vmem:[#allocation2] sm:$0xff] %vm41_vm0, %v633_v9 }
 0x681   :  { %v638_v12 = vadd.f32 %v637_v11, %v332_v10 }
 0x683   :  { %v648_v61 = vsel %vm647_vm3, %v638_v12, 0.0 }
 0x684   :  { %649 = vadd.xlane.f32.xlu1 %v648_v61 }
 0x695   :  { %641 = vrot.lane.b32.xlu1 %v600_v13, %s853_s13 }
 0x711   :  { %v650_v59 = vpop.xlane.xlu1 %649 }
 0x712   :  { %v651_v0 = vrot.slane %v650_v59, 4 }
 0x714   :  { %v652_v2 = vadd.f32 %v651_v0, %v650_v59 }
 0x715   :  { %v642_v14 = vpop.permute.xlu1 %641 }
 0x716   :  { %v653_v15 = vrot.slane %v652_v2, 2  ;;  %v644_v16 = vsel %vm41_vm0, %v642_v14, 0.0 }
 0x717   :  { %645 = vadd.xlane.f32.xlu0 %v644_v16 }
 0x718   :  { %v654_v62 = vadd.f32 %v653_v15, %v652_v2 }
 0x71a   :  { %v655_v17 = vrot.slane %v654_v62, 1 }
 0x71c   :  { %v656_v18 = vadd.f32 %v655_v17, %v654_v62 }
 0x71e   :  { %807 = vpush %v656_v18 }
 0x71f   :  { %837 = shalt.err (!%p834_p4)
}
 0x720   :  { %s838_s17 = scalar_lea.hbm %s1075_s8, 128 }
 0x721   :  { %p839_p5 = scmp.ne.s32.totalorder %s1075_s8, %s838_s17  ;;  %p842_p6 = scmp.lt.u32.totalorder %s838_s17, %s1075_s8 }
 0x723   :  { %p844_p7 = pnand %p842_p6, %p839_p5 }
 0x725   :  { %847 = shalt.err (!%p844_p7)
}
 0x726   :  { %671 = dma.vmem_to_hbm [thread:$0]  %s669_s7, 128, %s1075_s8, [#allocation3]   ;;  %vm660_vm4 = vcmask 7168  }
 0x74f   :  { %s808_s23 = spop %807 }
 0x750   :  { %v658_v30 = vstv %s808_s23 }
 0x7a4   :  { %v646_v19 = vpop.xlane.xlu0 %645 }
 0x7a5   :  { %v659_v20 = vadd.f32 %v658_v30, %v646_v19 }
 0x7a7   :  { %661 = vst.msk [vmem:[%s1076_s9] sm:$0xff] %vm660_vm4, %v659_v20 }
 0x7a8   :  { %848 = dma.done.wait [#allocation3], 128  }
 0x7a9   :  { %849 = vsyncadd [#allocation3], 4294967168 }
 0x7aa   :  { %679 = vsyncpa [#allocation3], 1 }

</bundles_post_ra>
